<compile_context>
chip_gen: v6e
topology: v6e:2x2x1
jax: 0.10.0
libtpu: 0.0.40
codegen_flags: <defaults>
</compile_context>

<pallas_src>
import functools

import jax
import jax.numpy as jnp
from jax.experimental import pallas as pl
from jax.experimental.pallas import tpu as pltpu


LEAKY_SLOPE = 0.01  # torch.nn.LeakyReLU default negative_slope
LANE = 128          # TPU vreg lane width
SUBLANE = 8         # TPU vreg sublane count


def _leaky_relu(x):
    # max-form: mul + max (2 VPU ops/vreg) instead of cmp + select + mul.
    return jnp.maximum(x, LEAKY_SLOPE * x)


def _round_up(n, m):
    return ((n + m - 1) // m) * m


def _pad2(x, shape):
    r, c = x.shape
    return jnp.pad(x, ((0, shape[0] - r), (0, shape[1] - c)))


# ---------------------------------------------------------------------------
# Kernel
# ---------------------------------------------------------------------------
def dqn_kernel(x_ref,
               w1_ref, b1_ref,
               w2_ref, b2_ref,
               wq_ref, bq_ref,
               mask_ref,
               out_ref):
    """Base MLP (Linear -> LeakyReLU, x2) + folded dueling head + action mask.

    x:    [TB, S]
    w1:   [S,   H1p], b1: [1, H1p]
    w2:   [H1p, H2p], b2: [1, H2p]
    wq:   [H2p, Ap],  bq: [1, Ap]    (dueling head folded into one linear layer)
    mask: [1, Ap]
    out:  [TB, Ap]                   (lane-dense; caller slices the logical A columns)
    """
    h = x_ref[...]
    h = _leaky_relu(jnp.dot(h, w1_ref[...], preferred_element_type=jnp.float32)
                    + b1_ref[...])
    h = _leaky_relu(jnp.dot(h, w2_ref[...], preferred_element_type=jnp.float32)
                    + b2_ref[...])
    q = jnp.dot(h, wq_ref[...], preferred_element_type=jnp.float32) + bq_ref[...]
    out_ref[...] = (q + mask_ref[...]).astype(out_ref.dtype)


# ---------------------------------------------------------------------------
# One-time parameter packing (fold dueling head, pad to vreg tiles)
# ---------------------------------------------------------------------------
def pack_dqn_params(params, action_mask):
    """Fold the dueling head into a single linear layer and zero-pad all lane
    dimensions to 128 (K dims padded to the previous layer's padded width) so the
    kernel never issues masked loads/stores or per-call relayouts."""
    w1, b1, w2, b2, wv, bv, wa, ba = params
    s_dim, h1 = w1.shape
    h2, num_actions = wa.shape

    # Dueling fold:  Q = V + (A - mean_a A)
    #             == h @ (wv + wa - mean_cols(wa)) + (bv + ba - mean(ba))
    wq = wv + wa - jnp.mean(wa, axis=1, keepdims=True)   # [H2, A]
    bq = bv + ba - jnp.mean(ba, axis=1, keepdims=True)   # [1,  A]

    h1p = _round_up(h1, LANE)
    h2p = _round_up(h2, LANE)
    ap = _round_up(num_actions, LANE)

    packed = (
        _pad2(w1, (s_dim, h1p)),
        _pad2(b1, (1, h1p)),
        _pad2(w2, (h1p, h2p)),
        _pad2(b2, (1, h2p)),
        _pad2(wq, (h2p, ap)),
        _pad2(bq, (1, ap)),
        _pad2(action_mask, (1, ap)),
    )
    return packed, num_actions


# ---------------------------------------------------------------------------
# Forward wrapper
# ---------------------------------------------------------------------------
def dqn_forward(states, packed_params, num_actions, *, block_batch=None):
    w1p, b1p, w2p, b2p, wqp, bqp, maskp = packed_params
    batch, s_dim = states.shape
    h1p = w1p.shape[1]
    h2p = w2p.shape[1]
    ap = wqp.shape[1]

    if block_batch is None:
        # Big enough to amortize per-grid-step overhead, small enough for any
        # generation's scoped VMEM (a [512, 128] f32 tile is only 256 KiB).
        block_batch = min(512, _round_up(batch, SUBLANE))
    tb = block_batch
    b_pad = _round_up(batch, tb)
    if b_pad != batch:
        states = jnp.pad(states, ((0, b_pad - batch), (0, 0)))

    const = lambda i: (0, 0)  # weights/biases/mask stay resident across the batch grid

    out = pl.pallas_call(
        dqn_kernel,
        out_shape=jax.ShapeDtypeStruct((b_pad, ap), jnp.float32),
        grid_spec=pltpu.PrefetchScalarGridSpec(
            num_scalar_prefetch=0,
            grid=(b_pad // tb,),
            in_specs=[
                pl.BlockSpec((tb, s_dim), lambda i: (i, 0)),   # x rows
                pl.BlockSpec((s_dim, h1p), const),
                pl.BlockSpec((1, h1p), const),
                pl.BlockSpec((h1p, h2p), const),
                pl.BlockSpec((1, h2p), const),
                pl.BlockSpec((h2p, ap), const),
                pl.BlockSpec((1, ap), const),
                pl.BlockSpec((1, ap), const),
            ],
            out_specs=pl.BlockSpec((tb, ap), lambda i: (i, 0)),  # lane-dense store
        ),
        compiler_params=pltpu.CompilerParams(
            dimension_semantics=("parallel",)),
    )(states, w1p, b1p, w2p, b2p, wqp, bqp, maskp)

    # Drop batch padding and padded action lanes outside the kernel.
    return out[:batch, :num_actions]


# ---------------------------------------------------------------------------
# Init mirroring DQN.__init__
# ---------------------------------------------------------------------------
def xavier_uniform(key, fan_in, fan_out, dtype=jnp.float32):
    # torch.nn.init.xavier_uniform_: U(-a, a), a = sqrt(6 / (fan_in + fan_out))
    bound = jnp.sqrt(6.0 / (fan_in + fan_out))
    return jax.random.uniform(key, (fan_in, fan_out), dtype=dtype,
                              minval=-bound, maxval=bound)


def init_dqn_params(key, state_dim, hidden_dims, num_actions):
    """Deterministic param init mirroring DQN.__init__ (xavier weights, bias=0.01).
    Weights stored as [in_features, out_features] (transposed vs. PyTorch)."""
    dims = (state_dim,) + hidden_dims
    keys = jax.random.split(key, len(dims) + 1)
    params = []
    for i in range(len(dims) - 1):
        w = xavier_uniform(keys[i], dims[i], dims[i + 1])
        b = jnp.full((1, dims[i + 1]), 0.01, dtype=jnp.float32)
        params += [w, b]
    kv, ka = jax.random.split(keys[-1])
    wv = xavier_uniform(kv, dims[-1], 1)
    bv = jnp.full((1, 1), 0.01, dtype=jnp.float32)
    wa = xavier_uniform(ka, dims[-1], num_actions)
    ba = jnp.full((1, num_actions), 0.01, dtype=jnp.float32)
    params += [wv, bv, wa, ba]
    return tuple(params)


def make_action_mask(num_actions, disallowed_actions):
    # TODO(synk): PyTorch registers the mask buffer as float64 (promoting the model
    # output to float64); the TPU kernel keeps everything in float32.
    mask = jnp.zeros((1, num_actions), dtype=jnp.float32)
    for a in disallowed_actions:
        mask = mask.at[0, a].set(-1e6)
    return mask


# ---------------------------------------------------------------------------
# Pure-JAX reference (unfolded dueling head) for sanity checking
# ---------------------------------------------------------------------------
def dqn_reference(states, params, action_mask):
    w1, b1, w2, b2, wv, bv, wa, ba = params
    h = _leaky_relu(states @ w1 + b1)
    h = _leaky_relu(h @ w2 + b2)
    adv = h @ wa + ba
    val = h @ wv + bv
    return val + (adv - jnp.mean(adv, axis=1, keepdims=True)) + action_mask


if __name__ == "__main__":
    # Shapes consistent with DQN(state_dim=10, hidden_dims=(32, 32), num_actions=4,
    #                            disallowed_actions=(1,), dueling=True)
    state_dim = 10
    hidden_dims = (32, 32)
    num_actions = 4
    disallowed_actions = (1,)
    batch = 8

    key = jax.random.PRNGKey(0)
    k_params, k_states = jax.random.split(key)

    params = init_dqn_params(k_params, state_dim, hidden_dims, num_actions)
    action_mask = make_action_mask(num_actions, disallowed_actions)
    states = jax.random.normal(k_states, (batch, state_dim), dtype=jnp.float32)

    packed, n_act = pack_dqn_params(params, action_mask)

    out = dqn_forward(states, packed, n_act)
    out = jax.block_until_ready(out)

    ref = dqn_reference(states, params, action_mask)
    assert out.shape == (batch, num_actions)
    assert jnp.allclose(out, ref, atol=1e-3, rtol=1e-4), "kernel mismatch vs reference"

    print("KERNEL_OK")
</pallas_src>

<mosaic_0001>
module attributes {stable_mosaic.version = 11 : i64} {
  func.func @dqn_kernel(%arg0: i32, %arg1: memref<8x10xf32, #tpu.memory_space<vmem>>, %arg2: memref<10x128xf32, #tpu.memory_space<vmem>>, %arg3: memref<1x128xf32, #tpu.memory_space<vmem>>, %arg4: memref<128x128xf32, #tpu.memory_space<vmem>>, %arg5: memref<1x128xf32, #tpu.memory_space<vmem>>, %arg6: memref<128x128xf32, #tpu.memory_space<vmem>>, %arg7: memref<1x128xf32, #tpu.memory_space<vmem>>, %arg8: memref<1x128xf32, #tpu.memory_space<vmem>>, %arg9: memref<8x128xf32, #tpu.memory_space<vmem>>) attributes {dimension_semantics = [#tpu.dimension_semantics<parallel>], iteration_bounds = array<i64: 1>, scalar_prefetch = 0 : i64, scratch_operands = 0 : i64, tpu.core_type = #tpu.core_type<tc>, window_params = [{transform_indices = @transform_0, window_bounds = array<i64: 8, 10>}, {pipeline_mode = #tpu.pipeline_mode<synchronous>, transform_indices = @transform_1, window_bounds = array<i64: 10, 128>}, {pipeline_mode = #tpu.pipeline_mode<synchronous>, transform_indices = @transform_2, window_bounds = array<i64: 1, 128>}, {pipeline_mode = #tpu.pipeline_mode<synchronous>, transform_indices = @transform_3, window_bounds = array<i64: 128, 128>}, {pipeline_mode = #tpu.pipeline_mode<synchronous>, transform_indices = @transform_4, window_bounds = array<i64: 1, 128>}, {pipeline_mode = #tpu.pipeline_mode<synchronous>, transform_indices = @transform_5, window_bounds = array<i64: 128, 128>}, {pipeline_mode = #tpu.pipeline_mode<synchronous>, transform_indices = @transform_6, window_bounds = array<i64: 1, 128>}, {pipeline_mode = #tpu.pipeline_mode<synchronous>, transform_indices = @transform_7, window_bounds = array<i64: 1, 128>}, {transform_indices = @transform_8, window_bounds = array<i64: 8, 128>}]} {
    %c0 = arith.constant 0 : index
    %c0_0 = arith.constant 0 : index
    %0 = vector.load %arg1[%c0, %c0_0] : memref<8x10xf32, #tpu.memory_space<vmem>>, vector<8x10xf32>
    %c0_1 = arith.constant 0 : index
    %c0_2 = arith.constant 0 : index
    %1 = vector.load %arg2[%c0_1, %c0_2] : memref<10x128xf32, #tpu.memory_space<vmem>>, vector<10x128xf32>
    %cst = arith.constant dense<0.000000e+00> : vector<8x128xf32>
    %2 = tpu.matmul %0, %1, %cst {dimension_numbers = #tpu.dot_dimension_numbers<[1], [0], [0], [1], [0, 0, 1, 1], [], []>} : vector<8x10xf32>, vector<10x128xf32>, vector<8x128xf32> -> vector<8x128xf32>
    %c0_3 = arith.constant 0 : index
    %c0_4 = arith.constant 0 : index
    %3 = vector.load %arg3[%c0_3, %c0_4] : memref<1x128xf32, #tpu.memory_space<vmem>>, vector<1x128xf32>
    %4 = vector.broadcast %3 : vector<1x128xf32> to vector<8x128xf32>
    %5 = arith.addf %2, %4 : vector<8x128xf32>
    %cst_5 = arith.constant 0.00999999977 : f32
    %6 = vector.broadcast %cst_5 : f32 to vector<8x128xf32>
    %7 = arith.mulf %6, %5 : vector<8x128xf32>
    %8 = arith.maximumf %5, %7 : vector<8x128xf32>
    %c0_6 = arith.constant 0 : index
    %c0_7 = arith.constant 0 : index
    %9 = vector.load %arg4[%c0_6, %c0_7] : memref<128x128xf32, #tpu.memory_space<vmem>>, vector<128x128xf32>
    %cst_8 = arith.constant dense<0.000000e+00> : vector<8x128xf32>
    %10 = tpu.matmul %8, %9, %cst_8 {dimension_numbers = #tpu.dot_dimension_numbers<[1], [0], [0], [1], [0, 0, 1, 1], [], []>} : vector<8x128xf32>, vector<128x128xf32>, vector<8x128xf32> -> vector<8x128xf32>
    %c0_9 = arith.constant 0 : index
    %c0_10 = arith.constant 0 : index
    %11 = vector.load %arg5[%c0_9, %c0_10] : memref<1x128xf32, #tpu.memory_space<vmem>>, vector<1x128xf32>
    %12 = vector.broadcast %11 : vector<1x128xf32> to vector<8x128xf32>
    %13 = arith.addf %10, %12 : vector<8x128xf32>
    %cst_11 = arith.constant 0.00999999977 : f32
    %14 = vector.broadcast %cst_11 : f32 to vector<8x128xf32>
    %15 = arith.mulf %14, %13 : vector<8x128xf32>
    %16 = arith.maximumf %13, %15 : vector<8x128xf32>
    %c0_12 = arith.constant 0 : index
    %c0_13 = arith.constant 0 : index
    %17 = vector.load %arg6[%c0_12, %c0_13] : memref<128x128xf32, #tpu.memory_space<vmem>>, vector<128x128xf32>
    %cst_14 = arith.constant dense<0.000000e+00> : vector<8x128xf32>
    %18 = tpu.matmul %16, %17, %cst_14 {dimension_numbers = #tpu.dot_dimension_numbers<[1], [0], [0], [1], [0, 0, 1, 1], [], []>} : vector<8x128xf32>, vector<128x128xf32>, vector<8x128xf32> -> vector<8x128xf32>
    %c0_15 = arith.constant 0 : index
    %c0_16 = arith.constant 0 : index
    %19 = vector.load %arg7[%c0_15, %c0_16] : memref<1x128xf32, #tpu.memory_space<vmem>>, vector<1x128xf32>
    %20 = vector.broadcast %19 : vector<1x128xf32> to vector<8x128xf32>
    %21 = arith.addf %18, %20 : vector<8x128xf32>
    %c0_17 = arith.constant 0 : index
    %c0_18 = arith.constant 0 : index
    %22 = vector.load %arg8[%c0_17, %c0_18] : memref<1x128xf32, #tpu.memory_space<vmem>>, vector<1x128xf32>
    %23 = vector.broadcast %22 : vector<1x128xf32> to vector<8x128xf32>
    %24 = arith.addf %21, %23 : vector<8x128xf32>
    %c0_19 = arith.constant 0 : index
    %c0_20 = arith.constant 0 : index
    %25 = vector.load %arg9[%c0_19, %c0_20] : memref<8x128xf32, #tpu.memory_space<vmem>>, vector<8x128xf32>
    tpu.vector_store %arg9[%c0_19, %c0_20], %24 {strides = array<i32>} : memref<8x128xf32, #tpu.memory_space<vmem>>, vector<8x128xf32>,
    return
  }
  func.func @transform_0(%arg0: i32) -> (i32, i32) {
    %c0_i32 = arith.constant 0 : i32
    %c0_i32_0 = arith.constant 0 : i32
    return %arg0, %c0_i32 : i32, i32
  }
  func.func @transform_1(%arg0: i32) -> (i32, i32) {
    %c0_i32 = arith.constant 0 : i32
    %c0_i32_0 = arith.constant 0 : i32
    %c0_i32_1 = arith.constant 0 : i32
    return %c0_i32, %c0_i32_0 : i32, i32
  }
  func.func @transform_2(%arg0: i32) -> (i32, i32) {
    %c0_i32 = arith.constant 0 : i32
    %c0_i32_0 = arith.constant 0 : i32
    %c0_i32_1 = arith.constant 0 : i32
    return %c0_i32, %c0_i32_0 : i32, i32
  }
  func.func @transform_3(%arg0: i32) -> (i32, i32) {
    %c0_i32 = arith.constant 0 : i32
    %c0_i32_0 = arith.constant 0 : i32
    %c0_i32_1 = arith.constant 0 : i32
    return %c0_i32, %c0_i32_0 : i32, i32
  }
  func.func @transform_4(%arg0: i32) -> (i32, i32) {
    %c0_i32 = arith.constant 0 : i32
    %c0_i32_0 = arith.constant 0 : i32
    %c0_i32_1 = arith.constant 0 : i32
    return %c0_i32, %c0_i32_0 : i32, i32
  }
  func.func @transform_5(%arg0: i32) -> (i32, i32) {
    %c0_i32 = arith.constant 0 : i32
    %c0_i32_0 = arith.constant 0 : i32
    %c0_i32_1 = arith.constant 0 : i32
    return %c0_i32, %c0_i32_0 : i32, i32
  }
  func.func @transform_6(%arg0: i32) -> (i32, i32) {
    %c0_i32 = arith.constant 0 : i32
    %c0_i32_0 = arith.constant 0 : i32
    %c0_i32_1 = arith.constant 0 : i32
    return %c0_i32, %c0_i32_0 : i32, i32
  }
  func.func @transform_7(%arg0: i32) -> (i32, i32) {
    %c0_i32 = arith.constant 0 : i32
    %c0_i32_0 = arith.constant 0 : i32
    %c0_i32_1 = arith.constant 0 : i32
    return %c0_i32, %c0_i32_0 : i32, i32
  }
  func.func @transform_8(%arg0: i32) -> (i32, i32) {
    %c0_i32 = arith.constant 0 : i32
    %c0_i32_0 = arith.constant 0 : i32
    return %arg0, %c0_i32 : i32, i32
  }
}

</mosaic_0001>

<bundles_post_ra>
// kernel: tpu_custom_call.1
= control target key start
LH: loop header
LB: loop body
LE: loop exit
PB: predicated region body
PF: predicated region fallthrough
CT: control target
= control target key end

     0   :  { %13 = vsyncpa [#allocation3], 0  ;;  %s754_s0 = inlined_call_operand.hbm [shape: f32[8,10], index: 0, kind: input, shape index: {}]   ;;  %s755_s1 = inlined_call_operand.hbm [shape: f32[10,128], index: 1, kind: input, shape index: {}]   ;;  %s756_s2 = inlined_call_operand.vmem [shape: f32[1,128], index: 2, kind: input, shape index: {}]   ;;  %s757_s3 = inlined_call_operand.hbm [shape: f32[128,128], index: 3, kind: input, shape index: {}]   ;;  %s758_s4 = inlined_call_operand.vmem [shape: f32[1,128], index: 4, kind: input, shape index: {}]   ;;  %s759_s5 = inlined_call_operand.hbm [shape: f32[128,128], index: 5, kind: input, shape index: {}]   ;;  %s760_s6 = inlined_call_operand.vmem [shape: f32[1,128], index: 6, kind: input, shape index: {}]   ;;  %s761_s7 = inlined_call_operand.vmem [shape: f32[1,128], index: 7, kind: input, shape index: {}]   ;;  %s762_s8 = inlined_call_operand.hbm [shape: f32[8,128], index: 8, kind: output, shape index: {}]  }
   0x1   :  { %14 = vsyncpa [#allocation6], 0 }
   0x2   :  { %15 = vsyncpa [#allocation9], 0 }
   0x3   :  { %16 = vsyncpa [#allocation4], 0  ;;  %s624_s27 = smov [#allocation5]  }
   0x4   :  { %s32_s28 = sshll.u32 %s624_s27, 4  ;;  %s33_s28 = int_to_ptr.vmem [resolvable:$true] %s32_s28 }
   0x5   :  { %s524_s29 = scalar_lea.vmem %s33_s28, 256  ;;  %p529_p1 = scmp.lt.s32.totalorder %s33_s28, %s33_s28 }
   0x6   :  { %p525_p0 = scmp.ne.s32.totalorder %s33_s28, %s524_s29  ;;  %p530_p2 = scmp.lt.s32.totalorder %s524_s29, %s524_s29 }
   0x8   :  { %p531_p3 = por %p530_p2, %p529_p1 }
   0xa   :  { %p532_p4 = pnand %p531_p3, %p525_p0 }
   0xc   :  { %535 = shalt.err (!%p532_p4)
}
   0xd   :  { %s625_s30 = smov 128   ;;  %s626_s9 = smov 8  }
   0xe   :  { %38 = dma.hbm_to_vmem [thread:$0]  %s755_s1, 256, %s33_s28, [#allocation6], %s625_s30, %s625_s30, %s626_s9  }
   0xf   :  { %s627_s12 = smov [#allocation2]   ;;  %s628_s14 = smov [#allocation7]  }
  0x10   :  { %s23_s13 = sshll.u32 %s627_s12, 4  ;;  %s46_s15 = sshll.u32 %s628_s14, 4  ;;  %s24_s13 = int_to_ptr.vmem [resolvable:$true] %s23_s13  ;;  %s47_s15 = int_to_ptr.vmem [resolvable:$true] %s46_s15 }
  0x11   :  { %s544_s16 = scalar_lea.vmem %s24_s13, 128  ;;  %p549_p6 = scmp.lt.s32.totalorder %s24_s13, %s24_s13 }
  0x12   :  { %p545_p5 = scmp.ne.s32.totalorder %s24_s13, %s544_s16  ;;  %p550_p7 = scmp.lt.s32.totalorder %s544_s16, %s544_s16 }
  0x14   :  { %p551_p8 = por %p550_p7, %p549_p6 }
  0x16   :  { %p552_p9 = pnand %p551_p8, %p545_p5 }
  0x18   :  { %555 = shalt.err (!%p552_p9)
}
  0x19   :  { %26 = dma.hbm_to_vmem [thread:$0]  %s754_s0, 128, %s24_s13, [#allocation3]  }
  0x1a   :  { %s564_s19 = scalar_lea.vmem %s47_s15, 2048  ;;  %p569_p11 = scmp.lt.s32.totalorder %s47_s15, %s47_s15 }
  0x1b   :  { %p565_p10 = scmp.ne.s32.totalorder %s47_s15, %s564_s19  ;;  %p570_p12 = scmp.lt.s32.totalorder %s564_s19, %s564_s19 }
  0x1d   :  { %p571_p13 = por %p570_p12, %p569_p11 }
  0x1f   :  { %p572_p0 = pnand %p571_p13, %p565_p10 }
  0x21   :  { %575 = shalt.err (!%p572_p0)
}
  0x22   :  { %52 = dma.hbm_to_vmem [thread:$0]  %s757_s3, 2048, %s47_s15, [#allocation6], %s625_s30, %s625_s30, %s626_s9  }
  0x23   :  { %s629_s21 = smov [#allocation8]  }
  0x24   :  { %s60_s22 = sshll.u32 %s629_s21, 4  ;;  %s61_s22 = int_to_ptr.vmem [resolvable:$true] %s60_s22 }
  0x25   :  { %s584_s23 = scalar_lea.vmem %s61_s22, 2048  ;;  %p589_p2 = scmp.lt.s32.totalorder %s61_s22, %s61_s22 }
  0x26   :  { %p585_p1 = scmp.ne.s32.totalorder %s61_s22, %s584_s23  ;;  %p590_p3 = scmp.lt.s32.totalorder %s584_s23, %s584_s23 }
  0x28   :  { %p591_p4 = por %p590_p3, %p589_p2 }
  0x2a   :  { %p592_p5 = pnand %p591_p4, %p585_p1 }
  0x2c   :  { %595 = shalt.err (!%p592_p5)
}
  0x2d   :  { %66 = dma.hbm_to_vmem [thread:$0]  %s759_s5, 2048, %s61_s22, [#allocation9], %s625_s30, %s625_s30, %s626_s9  }
  0x2e   :  { %616 = dma.done.wait [#allocation3], 128  }
  0x2f   :  { %617 = vsyncadd [#allocation3], 4294967168 }
  0x30   :  { %618 = dma.done.wait [#allocation6], 2304  }
  0x31   :  { %619 = vsyncadd [#allocation6], 4294964992 }
  0x32   :  { %620 = dma.done.wait [#allocation9], 2048  }
  0x33   :  { %621 = vsyncadd [#allocation9], 4294965248  ;;  %v630_v0 = vmov 0.0   ;;  %vm631_vm0 = vmmov 0   ;;  %vm97_vm1 = vcmask 1041408   ;;  %v84_v2 = vld [vmem:[#allocation5] sm:$0xff] }
  0x34   :  { %430 = vmatprep.subr.mxu0 %v630_v0  ;;  %434 = vmatprep.mubr.msk.f32.mxu0 %vm631_vm0, %v630_v0  ;;  %v85_v1 = vld [vmem:[#allocation5 + $0x8] sm:$0x3]  ;;  %v83_v3 = vld [vmem:[#allocation2] sm:$0xff]  ;;  %vm93_vm2 = vcmask 80896   ;;  %v187_v5 = vld [vmem:[#allocation7 + $0x70] sm:$0xff]  ;;  %s632_s30 = smov [#allocation10]  }
  0x35   :  { %437 = vmatprep.subr.mxu1 %v630_v0  ;;  %469 = vmatprep.mubr.msk.f32.mxu1 %vm631_vm0, %v630_v0  ;;  %v188_v4 = vld [vmem:[#allocation7 + $0x78] sm:$0xff]  ;;  %v186_v6 = vld [vmem:[#allocation7 + $0x68] sm:$0xff]  ;;  %v185_v7 = vld [vmem:[#allocation7 + $0x60] sm:$0xff]  ;;  %s376_s9 = sshll.u32 %s632_s30, 4  ;;  %s377_s9 = int_to_ptr.vmem [resolvable:$true] %s376_s9 }
  0x36   :  { %431 = vmatpush3.msk.msra.mxu0 %vm97_vm1, %v85_v1  ;;  %438 = vmatpush3.msra.mxu1 %v188_v4  ;;  %v184_v8 = vld [vmem:[#allocation7 + $0x58] sm:$0xff]  ;;  %v183_v9 = vld [vmem:[#allocation7 + $0x50] sm:$0xff]  ;;  %v182_v10 = vld [vmem:[#allocation7 + $0x48] sm:$0xff]  ;;  %p601_p7 = scmp.lt.s32.totalorder %s377_s9, %s377_s9 }
  0x37   :  { %432 = vmatprep.subr.mxu0 %v630_v0  ;;  %439 = vmatprep.subr.mxu1 %v630_v0  ;;  %v181_v11 = vld [vmem:[#allocation7 + $0x40] sm:$0xff]  ;;  %v180_v12 = vld [vmem:[#allocation7 + $0x38] sm:$0xff]  ;;  %v179_v13 = vld [vmem:[#allocation7 + $0x30] sm:$0xff] }
  0x38   :  { %433 = vmatpush3.msra.mxu0 %v84_v2  ;;  %440 = vmatpush3.msra.mxu1 %v187_v5  ;;  %v178_v14 = vld [vmem:[#allocation7 + $0x28] sm:$0xff]  ;;  %v177_v15 = vld [vmem:[#allocation7 + $0x20] sm:$0xff]  ;;  %v176_v16 = vld [vmem:[#allocation7 + $0x18] sm:$0xff] }
  0x39   :  { %435 = vmatmul.mubr.msk.f32.vlgmr.msra.gmra.mxu0 %vm93_vm2, %v83_v3  ;;  %441 = vmatprep.subr.mxu1 %v630_v0  ;;  %v175_v17 = vld [vmem:[#allocation7 + $0x10] sm:$0xff]  ;;  %v174_v18 = vld [vmem:[#allocation7 + $0x8] sm:$0xff]  ;;  %v173_v19 = vld [vmem:[#allocation7] sm:$0xff] }
  0x3a   :  { %472 = vmatprep.subr.mxu0 %v630_v0  ;;  %442 = vmatpush3.msra.mxu1 %v186_v6  ;;  %v283_v20 = vld [vmem:[#allocation8 + $0x78] sm:$0xff]  ;;  %v282_v21 = vld [vmem:[#allocation8 + $0x70] sm:$0xff]  ;;  %v281_v22 = vld [vmem:[#allocation8 + $0x68] sm:$0xff] }
  0x3b   :  { %504 = vmatprep.mubr.msk.f32.mxu0 %vm631_vm0, %v630_v0  ;;  %443 = vmatprep.subr.mxu1 %v630_v0  ;;  %v280_v23 = vld [vmem:[#allocation8 + $0x60] sm:$0xff]  ;;  %v279_v24 = vld [vmem:[#allocation8 + $0x58] sm:$0xff]  ;;  %v278_v25 = vld [vmem:[#allocation8 + $0x50] sm:$0xff] }
  0x3c   :  { %444 = vmatpush3.msra.mxu1 %v185_v7  ;;  %473 = vmatpush3.msra.mxu0 %v283_v20  ;;  %v277_v26 = vld [vmem:[#allocation8 + $0x48] sm:$0xff]  ;;  %v276_v27 = vld [vmem:[#allocation8 + $0x40] sm:$0xff]  ;;  %v275_v28 = vld [vmem:[#allocation8 + $0x38] sm:$0xff] }
  0x3d   :  { %445 = vmatprep.subr.mxu1 %v630_v0  ;;  %474 = vmatprep.subr.mxu0 %v630_v0  ;;  %v274_v29 = vld [vmem:[#allocation8 + $0x30] sm:$0xff]  ;;  %v273_v30 = vld [vmem:[#allocation8 + $0x28] sm:$0xff]  ;;  %v272_v31 = vld [vmem:[#allocation8 + $0x20] sm:$0xff] }
  0x3e   :  { %446 = vmatpush3.msra.mxu1 %v184_v8  ;;  %475 = vmatpush3.msra.mxu0 %v282_v21  ;;  %v387_v32 = vld [vmem:[%s756_s2] ss:$0 sm:$0xff]  ;;  %v271_v38 = vld [vmem:[#allocation8 + $0x18] sm:$0xff]  ;;  %v270_v39 = vld [vmem:[#allocation8 + $0x10] sm:$0xff] }
  0x3f   :  { %447 = vmatprep.subr.mxu1 %v630_v0  ;;  %476 = vmatprep.subr.mxu0 %v630_v0  ;;  %v269_v40 = vld [vmem:[#allocation8 + $0x8] sm:$0xff]  ;;  %v268_v41 = vld [vmem:[#allocation8] sm:$0xff] }
  0x40   :  { %448 = vmatpush3.msra.mxu1 %v183_v9  ;;  %477 = vmatpush3.msra.mxu0 %v281_v22  ;;  %v390_v42 = vld [vmem:[%s758_s4] ss:$0 sm:$0xff]  ;;  %s596_s4 = scalar_lea.vmem %s377_s9, 128 }
  0x41   :  { %449 = vmatprep.subr.mxu1 %v630_v0  ;;  %478 = vmatprep.subr.mxu0 %v630_v0  ;;  %v391_v48 = vld [vmem:[%s760_s6] ss:$0 sm:$0xff]  ;;  %p597_p6 = scmp.ne.s32.totalorder %s377_s9, %s596_s4  ;;  %p602_p8 = scmp.lt.s32.totalorder %s596_s4, %s596_s4 }
  0x42   :  { %450 = vmatpush3.msra.mxu1 %v182_v10  ;;  %479 = vmatpush3.msra.mxu0 %v280_v23  ;;  %v392_v50 = vld [vmem:[%s761_s7] ss:$0 sm:$0xff] }
  0x43   :  { %451 = vmatprep.subr.mxu1 %v630_v0  ;;  %480 = vmatprep.subr.mxu0 %v630_v0  ;;  %p603_p9 = por %p602_p8, %p601_p7 }
  0x44   :  { %452 = vmatpush3.msra.mxu1 %v181_v11  ;;  %481 = vmatpush3.msra.mxu0 %v279_v24 }
  0x45   :  { %453 = vmatprep.subr.mxu1 %v630_v0  ;;  %482 = vmatprep.subr.mxu0 %v630_v0  ;;  %p604_p10 = pnand %p603_p9, %p597_p6 }
  0x46   :  { %454 = vmatpush3.msra.mxu1 %v180_v12  ;;  %483 = vmatpush3.msra.mxu0 %v278_v25 }
  0x47   :  { %455 = vmatprep.subr.mxu1 %v630_v0  ;;  %484 = vmatprep.subr.mxu0 %v630_v0 }
  0x48   :  { %456 = vmatpush3.msra.mxu1 %v179_v13  ;;  %485 = vmatpush3.msra.mxu0 %v277_v26 }
  0x49   :  { %457 = vmatprep.subr.mxu1 %v630_v0  ;;  %486 = vmatprep.subr.mxu0 %v630_v0 }
  0x4a   :  { %458 = vmatpush3.msra.mxu1 %v178_v14  ;;  %487 = vmatpush3.msra.mxu0 %v276_v27 }
  0x4b   :  { %459 = vmatprep.subr.mxu1 %v630_v0  ;;  %488 = vmatprep.subr.mxu0 %v630_v0 }
  0x4c   :  { %460 = vmatpush3.msra.mxu1 %v177_v15  ;;  %489 = vmatpush3.msra.mxu0 %v275_v28 }
  0x4d   :  { %461 = vmatprep.subr.mxu1 %v630_v0  ;;  %490 = vmatprep.subr.mxu0 %v630_v0 }
  0x4e   :  { %462 = vmatpush3.msra.mxu1 %v176_v16  ;;  %491 = vmatpush3.msra.mxu0 %v274_v29 }
  0x4f   :  { %463 = vmatprep.subr.mxu1 %v630_v0  ;;  %492 = vmatprep.subr.mxu0 %v630_v0 }
  0x50   :  { %464 = vmatpush3.msra.mxu1 %v175_v17  ;;  %493 = vmatpush3.msra.mxu0 %v273_v30 }
  0x51   :  { %465 = vmatprep.subr.mxu1 %v630_v0  ;;  %494 = vmatprep.subr.mxu0 %v630_v0 }
  0x52   :  { %466 = vmatpush3.msra.mxu1 %v174_v18  ;;  %495 = vmatpush3.msra.mxu0 %v272_v31 }
  0x53   :  { %467 = vmatprep.subr.mxu1 %v630_v0  ;;  %496 = vmatprep.subr.mxu0 %v630_v0 }
  0x54   :  { %468 = vmatpush3.msra.mxu1 %v173_v19  ;;  %497 = vmatpush3.msra.mxu0 %v271_v38 }
  0x55   :  { %498 = vmatprep.subr.mxu0 %v630_v0 }
  0x56   :  { %499 = vmatpush3.msra.mxu0 %v270_v39 }
  0x57   :  { %500 = vmatprep.subr.mxu0 %v630_v0 }
  0x58   :  { %501 = vmatpush3.msra.mxu0 %v269_v40 }
  0x59   :  { %502 = vmatprep.subr.mxu0 %v630_v0 }
  0x5a   :  { %503 = vmatpush3.msra.mxu0 %v268_v41 }
  0xf9   :  { %v167_v33 = vpop.f32.mrf.mxu0 }
  0xfa   :  { %v168_v34 = vadd.f32 %v387_v32, %v167_v33 }
  0xfb   :  { %v436_v35 = vpop.f32.mrf.mxu0 }
  0xfc   :  { %v171_v36 = vmul.f32 0.01, %v168_v34 }
  0xfe   :  { %v172_v37 = vmax.f32 %v168_v34, %v171_v36 }
 0x100   :  { %470 = vmatmul.mubr.f32.vlgmr.msra.gmra.mxu1 %v172_v37 }
 0x1c0   :  { %v262_v43 = vpop.f32.mrf.mxu1 }
 0x1c1   :  { %v263_v44 = vadd.f32 %v390_v42, %v262_v43 }
 0x1c2   :  { %v471_v45 = vpop.f32.mrf.mxu1 }
 0x1c3   :  { %v266_v46 = vmul.f32 0.01, %v263_v44 }
 0x1c5   :  { %v267_v47 = vmax.f32 %v263_v44, %v266_v46 }
 0x1c7   :  { %505 = vmatmul.mubr.f32.vlgmr.msra.gmra.mxu0 %v267_v47 }
 0x287   :  { %v357_v49 = vpop.f32.mrf.mxu0 }
 0x288   :  { %v358_v51 = vadd.f32 %v391_v48, %v357_v49 }
 0x289   :  { %v506_v52 = vpop.f32.mrf.mxu0 }
 0x28a   :  { %v368_v53 = vadd.f32 %v392_v50, %v358_v51 }
 0x28c   :  { %369 = vst [vmem:[#allocation10] sm:$0xff] %v368_v53 }
 0x28d   :  { %607 = shalt.err (!%p604_p10)
}
 0x28e   :  { %379 = dma.vmem_to_hbm [thread:$0]  %s377_s9, 128, %s762_s8, [#allocation4]  }
 0x28f   :  { %622 = dma.done.wait [#allocation4], 128  }
 0x290   :  { %623 = vsyncadd [#allocation4], 4294967168 }
 0x291   :  { %383 = vsyncpa [#allocation3], 1 }
 0x292   :  { %384 = vsyncpa [#allocation6], 1 }
 0x293   :  { %385 = vsyncpa [#allocation9], 1 }
 0x294   :  { %386 = vsyncpa [#allocation4], 1 }

</bundles_post_ra>
